<compile_context>
chip_gen: v6e
topology: v6e:2x2x1
jax: 0.10.0
libtpu: 0.0.40
codegen_flags: <defaults>
</compile_context>

<pallas_src>
import itertools
import numpy as np
import jax
import jax.numpy as jnp
from jax.experimental import pallas as pl
from jax.experimental.pallas import tpu as pltpu


def _round_up(x: int, m: int) -> int:
    return ((x + m - 1) // m) * m


def _vmem_capacity_bytes() -> int:
    try:
        info = pltpu.get_tpu_info()
        cap = getattr(info, "vmem_capacity_bytes", None)
        if cap:
            return int(cap)
    except Exception:
        pass
    return 64 << 20  # conservative fallback (v7x per-core VMEM)


def _make_cost_kernel(bbox_w: float, giou_w: float):
    def cost_kernel(logits_ref, oboxes_ref, onehot_ref, tboxes_t_ref, cost_ref):
        # ---- softmax pieces (prob is never materialized) -----------------
        logits = logits_ref[...].astype(jnp.float32)               # (TN, Cpad)
        m = jnp.max(logits, axis=-1, keepdims=True)
        e = jnp.exp(logits - m)
        sum_e = jnp.sum(e, axis=-1, keepdims=True)                 # (TN, 1)

        # ---- class cost: gather-as-matmul on the MXU ----------------------
        # onehot is pre-scaled by -class_w in the wrapper, so this term comes
        # out pre-weighted and pre-negated.
        class_num = jnp.dot(e, onehot_ref[...],
                            preferred_element_type=jnp.float32)    # (TN, Tpad)
        class_term = class_num * pl.reciprocal(sum_e, approx=False)

        # ---- pairwise box costs -------------------------------------------
        ob = oboxes_ref[...]                                       # (TN, 4) cxcywh
        tb = tboxes_t_ref[...]                                     # (4, Tpad) cxcywh
        ocx, ocy, ow, oh = ob[:, 0:1], ob[:, 1:2], ob[:, 2:3], ob[:, 3:4]
        tcx, tcy, tw, th = tb[0:1, :], tb[1:2, :], tb[2:3, :], tb[3:4, :]

        # L1 cdist in cxcywh space; bbox_w folded into the skinny operands so
        # no extra (TN,Tpad)-shaped multiply is needed.
        if bbox_w == 1.0:
            sob, stb = ob, tb
        else:
            sob, stb = ob * bbox_w, tb * bbox_w
        l1 = (jnp.abs(sob[:, 0:1] - stb[0:1, :])
              + jnp.abs(sob[:, 1:2] - stb[1:2, :])
              + jnp.abs(sob[:, 2:3] - stb[2:3, :])
              + jnp.abs(sob[:, 3:4] - stb[3:4, :]))                # (TN, Tpad)

        # cxcywh -> xyxy (per-row / per-col skinny ops)
        ox0, oy0 = ocx - 0.5 * ow, ocy - 0.5 * oh
        ox1, oy1 = ocx + 0.5 * ow, ocy + 0.5 * oh
        tx0, ty0 = tcx - 0.5 * tw, tcy - 0.5 * th
        tx1, ty1 = tcx + 0.5 * tw, tcy + 0.5 * th

        area_o = (ox1 - ox0) * (oy1 - oy0)                         # (TN, 1)
        area_t = (tx1 - tx0) * (ty1 - ty0)                         # (1, Tpad)

        # signed intersection extents; reused for the enclosing box via
        #   max(ox1,tx1) - min(ox0,tx0) == (ow + tw) - (min(ox1,tx1)-max(ox0,tx0))
        iwr = jnp.minimum(ox1, tx1) - jnp.maximum(ox0, tx0)        # (TN, Tpad)
        ihr = jnp.minimum(oy1, ty1) - jnp.maximum(oy0, ty0)
        inter = jnp.maximum(iwr, 0.0) * jnp.maximum(ihr, 0.0)
        union = area_o + area_t - inter
        area_e = ((ow + tw) - iwr) * ((oh + th) - ihr)

        # divides -> reciprocals (approx=False keeps the 1e-5 reference match)
        iou = inter * pl.reciprocal(union, approx=False)
        enc = (area_e - union) * pl.reciprocal(area_e, approx=False)
        neg_giou = enc - iou                                       # == -GIoU

        gterm = neg_giou if giou_w == 1.0 else neg_giou * giou_w
        cost_ref[...] = (class_term + l1 + gterm).astype(cost_ref.dtype)

    return cost_kernel


def pallas_cost_matrix(logits_flat, out_boxes_flat, target_ids, target_boxes,
                       class_w=1.0, bbox_w=1.0, giou_w=1.0):
    """Returns the (N, T) cost matrix, computed with a tiled Pallas kernel."""
    N, C = logits_flat.shape
    T = int(target_ids.shape[0])

    # Class dim stays tight (full-dim block is always legal); target dim is
    # padded to 128 for lane-dense pairwise math and unmasked output stores.
    Cpad = _round_up(max(C, 1), 8)
    Tpad = _round_up(max(T, 1), 128)

    # ---- per-generation tile / VMEM budgets --------------------------------
    vmem_cap = _vmem_capacity_bytes()
    vmem_limit = min(64 << 20, (3 * vmem_cap) // 4)   # 64 MiB v5e/v6e, 48 MiB v7x
    tile_budget = (3 * vmem_limit) // 4

    lbytes = jnp.dtype(logits_flat.dtype).itemsize

    def tile_bytes(tn):
        # double-buffered DMA footprint (operands padded to (8,128) VMEM tiles)
        return 2 * (tn * _round_up(Cpad, 128) * lbytes      # logits tile
                    + tn * 128 * 4                          # out boxes (4 -> 128 lanes)
                    + _round_up(Cpad, 8) * Tpad * 4         # one-hot (grid-invariant)
                    + 8 * Tpad * 4                          # target boxes
                    + tn * Tpad * 4)                        # cost tile

    # Large tiles amortize per-step overhead on v5e/v6e; at least 2 grid steps
    # so dimension_semantics=("parallel",) can shard rows over v7x's 2 cores.
    TN_MAX = 2048
    n_steps = max(2, -(-N // TN_MAX))
    TN = max(8, _round_up(-(-N // n_steps), 8))
    while TN > 8 and tile_bytes(TN) > tile_budget:
        TN = max(8, _round_up(TN // 2, 8))      # keep (8,128) divisibility
    Npad = _round_up(N, TN)
    # TODO(synk): for very large target counts (Tpad*TN past the VMEM budget) a
    # second grid axis over T with the softmax hoisted into scratch would be
    # better than shrinking TN; not needed at DETR-scale shapes.

    f32 = jnp.float32
    # Single fused pad: rows with 0 (sliced away), padded class columns with
    # -1e30 so exp() contributes 0 to the softmax denominator.
    logits = jnp.pad(logits_flat, ((0, Npad - N), (0, Cpad - C)),
                     constant_values=((0.0, 0.0), (0.0, -1e30)))
    boxes = jnp.pad(out_boxes_flat.astype(f32), ((0, Npad - N), (0, 0)),
                    constant_values=0.5)

    # class cost weight (and its negation) folded into the one-hot operand
    onehot_t = (-float(class_w)) * jax.nn.one_hot(target_ids, Cpad, dtype=f32).T
    onehot_t = jnp.pad(onehot_t, ((0, 0), (0, Tpad - T)))          # (Cpad, Tpad)
    tboxes_t = jnp.pad(target_boxes.astype(f32),
                       ((0, Tpad - T), (0, 0))).T                  # (4, Tpad)

    kernel = _make_cost_kernel(float(bbox_w), float(giou_w))
    cost = pl.pallas_call(
        kernel,
        out_shape=jax.ShapeDtypeStruct((Npad, Tpad), f32),
        grid=(Npad // TN,),
        in_specs=[
            pl.BlockSpec((TN, Cpad), lambda i: (i, 0)),
            pl.BlockSpec((TN, 4), lambda i: (i, 0)),
            pl.BlockSpec((Cpad, Tpad), lambda i: (0, 0)),
            pl.BlockSpec((4, Tpad), lambda i: (0, 0)),
        ],
        out_specs=pl.BlockSpec((TN, Tpad), lambda i: (i, 0)),
        compiler_params=pltpu.CompilerParams(
            dimension_semantics=("parallel",),
            vmem_limit_bytes=int(vmem_limit),
        ),
    )(logits, boxes, onehot_t, tboxes_t)
    return cost[:N, :T]


# ----------------------- host-side reference / glue -----------------------

def _box_to_xy(b):
    cx, cy, w, h = b[..., 0], b[..., 1], b[..., 2], b[..., 3]
    return jnp.stack([cx - 0.5 * w, cy - 0.5 * h, cx + 0.5 * w, cy + 0.5 * h], axis=-1)


def _g_iou(a, b):
    area_a = (a[:, 2] - a[:, 0]) * (a[:, 3] - a[:, 1])
    area_b = (b[:, 2] - b[:, 0]) * (b[:, 3] - b[:, 1])
    lt = jnp.maximum(a[:, None, :2], b[None, :, :2])
    rb = jnp.minimum(a[:, None, 2:], b[None, :, 2:])
    wh = jnp.clip(rb - lt, 0.0)
    inter = wh[..., 0] * wh[..., 1]
    union = area_a[:, None] + area_b[None, :] - inter
    iou = inter / union
    lt_e = jnp.minimum(a[:, None, :2], b[None, :, :2])
    rb_e = jnp.maximum(a[:, None, 2:], b[None, :, 2:])
    wh_e = rb_e - lt_e
    area_e = wh_e[..., 0] * wh_e[..., 1]
    return iou - (area_e - union) / area_e


def _reference_cost(logits_flat, out_boxes_flat, target_ids, target_boxes,
                    class_w=1.0, bbox_w=1.0, giou_w=1.0):
    prob = jax.nn.softmax(logits_flat, axis=-1)
    class_cost = -prob[:, target_ids]
    bbox_cost = jnp.sum(jnp.abs(out_boxes_flat[:, None, :] - target_boxes[None, :, :]),
                        axis=-1)
    giou_cost = -_g_iou(_box_to_xy(out_boxes_flat), _box_to_xy(target_boxes))
    return bbox_w * bbox_cost + class_w * class_cost + giou_w * giou_cost


def _lap_jv(cost):
    """Shortest-augmenting-path (Jonker-Volgenant style) LAP, minimization.

    cost: (n, m) with n <= m; assigns every row a distinct column.
    Returns col_of_row (n,) int64.
    """
    cost = np.asarray(cost, dtype=np.float64)
    n, m = cost.shape
    INF = np.inf
    u = np.zeros(n + 1)
    v = np.zeros(m + 1)
    p = np.zeros(m + 1, dtype=np.int64)       # p[j] = row matched to column j (1-based)
    way = np.zeros(m + 1, dtype=np.int64)
    for i in range(1, n + 1):
        p[0] = i
        j0 = 0
        minv = np.full(m + 1, INF)
        used = np.zeros(m + 1, dtype=bool)
        while True:
            used[j0] = True
            i0 = p[j0]
            delta = INF
            j1 = 0
            for j in range(1, m + 1):
                if not used[j]:
                    cur = cost[i0 - 1, j - 1] - u[i0] - v[j]
                    if cur < minv[j]:
                        minv[j] = cur
                        way[j] = j0
                    if minv[j] < delta:
                        delta = minv[j]
                        j1 = j
            for j in range(m + 1):
                if used[j]:
                    u[p[j]] += delta
                    v[j] -= delta
                else:
                    minv[j] -= delta
            j0 = j1
            if p[j0] == 0:
                break
        while True:
            j1 = way[j0]
            p[j0] = p[j1]
            j0 = j1
            if j0 == 0:
                break
    col_of_row = np.zeros(n, dtype=np.int64)
    for j in range(1, m + 1):
        if p[j] > 0:
            col_of_row[p[j] - 1] = j - 1
    return col_of_row


def _linear_sum_assignment_np(cost):
    """Exact rectangular LAP on host (NumPy); returns scipy-style (rows, cols)."""
    # TODO(synk): the Hungarian assignment is a sequential combinatorial solve
    # with no clean Pallas equivalent; it stays on host.
    cost = np.asarray(cost, dtype=np.float64)
    R, K = cost.shape
    if K == 0:
        return np.zeros(0, np.int64), np.zeros(0, np.int64)
    if K <= R:
        rows = _lap_jv(cost.T)                 # row assigned to each target column
        cols = np.arange(K, dtype=np.int64)
    else:
        cols = _lap_jv(cost)
        rows = np.arange(R, dtype=np.int64)
    order = np.argsort(rows)
    return rows[order], cols[order]


def hungarian_matcher_forward(outputs, targets,
                              class_cost=1.0, bbox_cost=1.0, giou_cost=1.0):
    batch, num_query = outputs["logits"].shape[:2]
    logits_flat = outputs["logits"].reshape(batch * num_query, -1)
    boxes_flat = outputs["boxes"].reshape(batch * num_query, 4)
    target_ids = jnp.concatenate([v["labels"] for v in targets])
    target_bbox = jnp.concatenate([v["boxes"] for v in targets])

    cost_all = pallas_cost_matrix(logits_flat, boxes_flat, target_ids, target_bbox,
                                  class_w=class_cost, bbox_w=bbox_cost,
                                  giou_w=giou_cost)
    jax.block_until_ready(cost_all)

    cost_all = np.asarray(cost_all).reshape(batch, num_query, -1)
    sizes = [int(v["boxes"].shape[0]) for v in targets]
    splits = np.split(cost_all, np.cumsum(sizes)[:-1], axis=-1)
    indices = [_linear_sum_assignment_np(c[i]) for i, c in enumerate(splits)]
    return cost_all, indices


def _brute_force_best_cost(cost):
    R, K = cost.shape
    best = np.inf
    for perm in itertools.permutations(range(R), K):
        best = min(best, sum(cost[perm[k], k] for k in range(K)))
    return best


if __name__ == "__main__":
    key = jax.random.PRNGKey(0)
    B, Q, C = 2, 8, 8          # batch, num_query, num_classes
    sizes = [3, 4]             # targets per batch element

    k1, k2, k3, k4 = jax.random.split(key, 4)
    logits = jax.random.normal(k1, (B, Q, C), dtype=jnp.float32)
    boxes = jax.random.uniform(k2, (B, Q, 4), dtype=jnp.float32,
                               minval=0.1, maxval=0.4)  # cxcywh, positive w/h
    outputs = {"logits": logits, "boxes": boxes}

    targets = []
    tkeys = jax.random.split(k3, len(sizes))
    lkeys = jax.random.split(k4, len(sizes))
    for s, tk, lk in zip(sizes, tkeys, lkeys):
        targets.append({
            "labels": jax.random.randint(lk, (s,), 0, C, dtype=jnp.int32),
            "boxes": jax.random.uniform(tk, (s, 4), dtype=jnp.float32,
                                        minval=0.1, maxval=0.4),
        })

    cost_all, indices = hungarian_matcher_forward(outputs, targets)

    # validate the Pallas cost matrix against a pure-JAX reference
    logits_flat = logits.reshape(B * Q, C)
    boxes_flat = boxes.reshape(B * Q, 4)
    tids = jnp.concatenate([v["labels"] for v in targets])
    tboxes = jnp.concatenate([v["boxes"] for v in targets])
    ref = np.asarray(_reference_cost(logits_flat, boxes_flat, tids, tboxes))
    np.testing.assert_allclose(cost_all.reshape(B * Q, -1), ref,
                               rtol=1e-5, atol=1e-5)

    # validate the host-side assignment (optimal total cost vs brute force)
    splits = np.split(cost_all, np.cumsum(sizes)[:-1], axis=-1)
    assert len(indices) == B
    for b, ((i_idx, j_idx), s) in enumerate(zip(indices, sizes)):
        assert i_idx.shape == (s,) and j_idx.shape == (s,)
        assert i_idx.dtype == np.int64 and j_idx.dtype == np.int64
        cb = splits[b][b]
        got = float(cb[i_idx, j_idx].sum())
        best = float(_brute_force_best_cost(cb))
        assert abs(got - best) < 1e-4, (got, best)

    print("KERNEL_OK")
</pallas_src>

<mosaic_0001>
module attributes {stable_mosaic.version = 11 : i64} {
  func.func @cost_kernel(%arg0: i32, %arg1: memref<8x8xf32, #tpu.memory_space<vmem>>, %arg2: memref<8x4xf32, #tpu.memory_space<vmem>>, %arg3: memref<8x128xf32, #tpu.memory_space<vmem>>, %arg4: memref<4x128xf32, #tpu.memory_space<vmem>>, %arg5: memref<8x128xf32, #tpu.memory_space<vmem>>) attributes {dimension_semantics = [#tpu.dimension_semantics<parallel>], iteration_bounds = array<i64: 2>, scalar_prefetch = 0 : i64, scratch_operands = 0 : i64, tpu.core_type = #tpu.core_type<tc>, window_params = [{transform_indices = @transform_0, window_bounds = array<i64: 8, 8>}, {transform_indices = @transform_1, window_bounds = array<i64: 8, 4>}, {pipeline_mode = #tpu.pipeline_mode<synchronous>, transform_indices = @transform_2, window_bounds = array<i64: 8, 128>}, {pipeline_mode = #tpu.pipeline_mode<synchronous>, transform_indices = @transform_3, window_bounds = array<i64: 4, 128>}, {transform_indices = @transform_4, window_bounds = array<i64: 8, 128>}]} {
    %c0 = arith.constant 0 : index
    %c0_0 = arith.constant 0 : index
    %0 = vector.load %arg1[%c0, %c0_0] : memref<8x8xf32, #tpu.memory_space<vmem>>, vector<8x8xf32>
    %cst = arith.constant dense<0xFF800000> : vector<8xf32>
    %1 = vector.multi_reduction <maximumf>, %0, %cst [1] : vector<8x8xf32> to vector<8xf32>
    %2 = vector.shape_cast %1 : vector<8xf32> to vector<8x1xf32>
    %3 = vector.broadcast %2 : vector<8x1xf32> to vector<8x8xf32>
    %4 = arith.subf %0, %3 : vector<8x8xf32>
    %5 = math.exp %4 : vector<8x8xf32>
    %cst_1 = arith.constant dense<0.000000e+00> : vector<8xf32>
    %6 = vector.multi_reduction <add>, %5, %cst_1 [1] : vector<8x8xf32> to vector<8xf32>
    %7 = vector.shape_cast %6 : vector<8xf32> to vector<8x1xf32>
    %c0_2 = arith.constant 0 : index
    %c0_3 = arith.constant 0 : index
    %8 = vector.load %arg3[%c0_2, %c0_3] : memref<8x128xf32, #tpu.memory_space<vmem>>, vector<8x128xf32>
    %cst_4 = arith.constant dense<0.000000e+00> : vector<8x128xf32>
    %9 = tpu.matmul %5, %8, %cst_4 {dimension_numbers = #tpu.dot_dimension_numbers<[1], [0], [0], [1], [0, 0, 1, 1], [], []>} : vector<8x8xf32>, vector<8x128xf32>, vector<8x128xf32> -> vector<8x128xf32>
    %10 = tpu.reciprocal %7 : vector<8x1xf32> -> vector<8x1xf32>
    %11 = vector.broadcast %10 : vector<8x1xf32> to vector<8x128xf32>
    %12 = arith.mulf %9, %11 : vector<8x128xf32>
    %c0_5 = arith.constant 0 : index
    %c0_6 = arith.constant 0 : index
    %13 = vector.load %arg2[%c0_5, %c0_6] : memref<8x4xf32, #tpu.memory_space<vmem>>, vector<8x4xf32>
    %c0_7 = arith.constant 0 : index
    %c0_8 = arith.constant 0 : index
    %14 = vector.load %arg4[%c0_7, %c0_8] : memref<4x128xf32, #tpu.memory_space<vmem>>, vector<4x128xf32>
    %15 = vector.extract_strided_slice %13 {offsets = [0, 0], sizes = [8, 1], strides = [1, 1]} : vector<8x4xf32> to vector<8x1xf32>
    %16 = vector.extract_strided_slice %13 {offsets = [0, 1], sizes = [8, 1], strides = [1, 1]} : vector<8x4xf32> to vector<8x1xf32>
    %17 = vector.extract_strided_slice %13 {offsets = [0, 2], sizes = [8, 1], strides = [1, 1]} : vector<8x4xf32> to vector<8x1xf32>
    %18 = vector.extract_strided_slice %13 {offsets = [0, 3], sizes = [8, 1], strides = [1, 1]} : vector<8x4xf32> to vector<8x1xf32>
    %19 = vector.extract_strided_slice %14 {offsets = [0, 0], sizes = [1, 128], strides = [1, 1]} : vector<4x128xf32> to vector<1x128xf32>
    %20 = vector.extract_strided_slice %14 {offsets = [1, 0], sizes = [1, 128], strides = [1, 1]} : vector<4x128xf32> to vector<1x128xf32>
    %21 = vector.extract_strided_slice %14 {offsets = [2, 0], sizes = [1, 128], strides = [1, 1]} : vector<4x128xf32> to vector<1x128xf32>
    %22 = vector.extract_strided_slice %14 {offsets = [3, 0], sizes = [1, 128], strides = [1, 1]} : vector<4x128xf32> to vector<1x128xf32>
    %23 = vector.extract_strided_slice %13 {offsets = [0, 0], sizes = [8, 1], strides = [1, 1]} : vector<8x4xf32> to vector<8x1xf32>
    %24 = vector.extract_strided_slice %14 {offsets = [0, 0], sizes = [1, 128], strides = [1, 1]} : vector<4x128xf32> to vector<1x128xf32>
    %25 = vector.broadcast %23 : vector<8x1xf32> to vector<8x128xf32>
    %26 = vector.broadcast %24 : vector<1x128xf32> to vector<8x128xf32>
    %27 = arith.subf %25, %26 : vector<8x128xf32>
    %28 = math.absf %27 : vector<8x128xf32>
    %29 = vector.extract_strided_slice %13 {offsets = [0, 1], sizes = [8, 1], strides = [1, 1]} : vector<8x4xf32> to vector<8x1xf32>
    %30 = vector.extract_strided_slice %14 {offsets = [1, 0], sizes = [1, 128], strides = [1, 1]} : vector<4x128xf32> to vector<1x128xf32>
    %31 = vector.broadcast %29 : vector<8x1xf32> to vector<8x128xf32>
    %32 = vector.broadcast %30 : vector<1x128xf32> to vector<8x128xf32>
    %33 = arith.subf %31, %32 : vector<8x128xf32>
    %34 = math.absf %33 : vector<8x128xf32>
    %35 = arith.addf %28, %34 : vector<8x128xf32>
    %36 = vector.extract_strided_slice %13 {offsets = [0, 2], sizes = [8, 1], strides = [1, 1]} : vector<8x4xf32> to vector<8x1xf32>
    %37 = vector.extract_strided_slice %14 {offsets = [2, 0], sizes = [1, 128], strides = [1, 1]} : vector<4x128xf32> to vector<1x128xf32>
    %38 = vector.broadcast %36 : vector<8x1xf32> to vector<8x128xf32>
    %39 = vector.broadcast %37 : vector<1x128xf32> to vector<8x128xf32>
    %40 = arith.subf %38, %39 : vector<8x128xf32>
    %41 = math.absf %40 : vector<8x128xf32>
    %42 = arith.addf %35, %41 : vector<8x128xf32>
    %43 = vector.extract_strided_slice %13 {offsets = [0, 3], sizes = [8, 1], strides = [1, 1]} : vector<8x4xf32> to vector<8x1xf32>
    %44 = vector.extract_strided_slice %14 {offsets = [3, 0], sizes = [1, 128], strides = [1, 1]} : vector<4x128xf32> to vector<1x128xf32>
    %45 = vector.broadcast %43 : vector<8x1xf32> to vector<8x128xf32>
    %46 = vector.broadcast %44 : vector<1x128xf32> to vector<8x128xf32>
    %47 = arith.subf %45, %46 : vector<8x128xf32>
    %48 = math.absf %47 : vector<8x128xf32>
    %49 = arith.addf %42, %48 : vector<8x128xf32>
    %cst_9 = arith.constant 5.000000e-01 : f32
    %50 = vector.broadcast %cst_9 : f32 to vector<8x1xf32>
    %51 = arith.mulf %50, %17 : vector<8x1xf32>
    %52 = arith.subf %15, %51 : vector<8x1xf32>
    %cst_10 = arith.constant 5.000000e-01 : f32
    %53 = vector.broadcast %cst_10 : f32 to vector<8x1xf32>
    %54 = arith.mulf %53, %18 : vector<8x1xf32>
    %55 = arith.subf %16, %54 : vector<8x1xf32>
    %cst_11 = arith.constant 5.000000e-01 : f32
    %56 = vector.broadcast %cst_11 : f32 to vector<8x1xf32>
    %57 = arith.mulf %56, %17 : vector<8x1xf32>
    %58 = arith.addf %15, %57 : vector<8x1xf32>
    %cst_12 = arith.constant 5.000000e-01 : f32
    %59 = vector.broadcast %cst_12 : f32 to vector<8x1xf32>
    %60 = arith.mulf %59, %18 : vector<8x1xf32>
    %61 = arith.addf %16, %60 : vector<8x1xf32>
    %cst_13 = arith.constant 5.000000e-01 : f32
    %62 = vector.broadcast %cst_13 : f32 to vector<1x128xf32>
    %63 = arith.mulf %62, %21 : vector<1x128xf32>
    %64 = arith.subf %19, %63 : vector<1x128xf32>
    %cst_14 = arith.constant 5.000000e-01 : f32
    %65 = vector.broadcast %cst_14 : f32 to vector<1x128xf32>
    %66 = arith.mulf %65, %22 : vector<1x128xf32>
    %67 = arith.subf %20, %66 : vector<1x128xf32>
    %cst_15 = arith.constant 5.000000e-01 : f32
    %68 = vector.broadcast %cst_15 : f32 to vector<1x128xf32>
    %69 = arith.mulf %68, %21 : vector<1x128xf32>
    %70 = arith.addf %19, %69 : vector<1x128xf32>
    %cst_16 = arith.constant 5.000000e-01 : f32
    %71 = vector.broadcast %cst_16 : f32 to vector<1x128xf32>
    %72 = arith.mulf %71, %22 : vector<1x128xf32>
    %73 = arith.addf %20, %72 : vector<1x128xf32>
    %74 = arith.subf %58, %52 : vector<8x1xf32>
    %75 = arith.subf %61, %55 : vector<8x1xf32>
    %76 = arith.mulf %74, %75 : vector<8x1xf32>
    %77 = arith.subf %70, %64 : vector<1x128xf32>
    %78 = arith.subf %73, %67 : vector<1x128xf32>
    %79 = arith.mulf %77, %78 : vector<1x128xf32>
    %80 = vector.broadcast %58 : vector<8x1xf32> to vector<8x128xf32>
    %81 = vector.broadcast %70 : vector<1x128xf32> to vector<8x128xf32>
    %82 = arith.minimumf %80, %81 : vector<8x128xf32>
    %83 = vector.broadcast %52 : vector<8x1xf32> to vector<8x128xf32>
    %84 = vector.broadcast %64 : vector<1x128xf32> to vector<8x128xf32>
    %85 = arith.maximumf %83, %84 : vector<8x128xf32>
    %86 = arith.subf %82, %85 : vector<8x128xf32>
    %87 = vector.broadcast %61 : vector<8x1xf32> to vector<8x128xf32>
    %88 = vector.broadcast %73 : vector<1x128xf32> to vector<8x128xf32>
    %89 = arith.minimumf %87, %88 : vector<8x128xf32>
    %90 = vector.broadcast %55 : vector<8x1xf32> to vector<8x128xf32>
    %91 = vector.broadcast %67 : vector<1x128xf32> to vector<8x128xf32>
    %92 = arith.maximumf %90, %91 : vector<8x128xf32>
    %93 = arith.subf %89, %92 : vector<8x128xf32>
    %cst_17 = arith.constant 0.000000e+00 : f32
    %94 = vector.broadcast %cst_17 : f32 to vector<8x128xf32>
    %95 = arith.maximumf %86, %94 : vector<8x128xf32>
    %cst_18 = arith.constant 0.000000e+00 : f32
    %96 = vector.broadcast %cst_18 : f32 to vector<8x128xf32>
    %97 = arith.maximumf %93, %96 : vector<8x128xf32>
    %98 = arith.mulf %95, %97 : vector<8x128xf32>
    %99 = vector.broadcast %76 : vector<8x1xf32> to vector<8x128xf32>
    %100 = vector.broadcast %79 : vector<1x128xf32> to vector<8x128xf32>
    %101 = arith.addf %99, %100 : vector<8x128xf32>
    %102 = arith.subf %101, %98 : vector<8x128xf32>
    %103 = vector.broadcast %17 : vector<8x1xf32> to vector<8x128xf32>
    %104 = vector.broadcast %21 : vector<1x128xf32> to vector<8x128xf32>
    %105 = arith.addf %103, %104 : vector<8x128xf32>
    %106 = arith.subf %105, %86 : vector<8x128xf32>
    %107 = vector.broadcast %18 : vector<8x1xf32> to vector<8x128xf32>
    %108 = vector.broadcast %22 : vector<1x128xf32> to vector<8x128xf32>
    %109 = arith.addf %107, %108 : vector<8x128xf32>
    %110 = arith.subf %109, %93 : vector<8x128xf32>
    %111 = arith.mulf %106, %110 : vector<8x128xf32>
    %112 = tpu.reciprocal %102 : vector<8x128xf32> -> vector<8x128xf32>
    %113 = arith.mulf %98, %112 : vector<8x128xf32>
    %114 = arith.subf %111, %102 : vector<8x128xf32>
    %115 = tpu.reciprocal %111 : vector<8x128xf32> -> vector<8x128xf32>
    %116 = arith.mulf %114, %115 : vector<8x128xf32>
    %117 = arith.subf %116, %113 : vector<8x128xf32>
    %118 = arith.addf %12, %49 : vector<8x128xf32>
    %119 = arith.addf %118, %117 : vector<8x128xf32>
    %c0_19 = arith.constant 0 : index
    %c0_20 = arith.constant 0 : index
    %120 = vector.load %arg5[%c0_19, %c0_20] : memref<8x128xf32, #tpu.memory_space<vmem>>, vector<8x128xf32>
    tpu.vector_store %arg5[%c0_19, %c0_20], %119 {strides = array<i32>} : memref<8x128xf32, #tpu.memory_space<vmem>>, vector<8x128xf32>,
    return
  }
  func.func @transform_0(%arg0: i32) -> (i32, i32) {
    %c0_i32 = arith.constant 0 : i32
    %c0_i32_0 = arith.constant 0 : i32
    return %arg0, %c0_i32 : i32, i32
  }
  func.func @transform_1(%arg0: i32) -> (i32, i32) {
    %c0_i32 = arith.constant 0 : i32
    %c0_i32_0 = arith.constant 0 : i32
    return %arg0, %c0_i32 : i32, i32
  }
  func.func @transform_2(%arg0: i32) -> (i32, i32) {
    %c0_i32 = arith.constant 0 : i32
    %c0_i32_0 = arith.constant 0 : i32
    %c0_i32_1 = arith.constant 0 : i32
    return %c0_i32, %c0_i32_0 : i32, i32
  }
  func.func @transform_3(%arg0: i32) -> (i32, i32) {
    %c0_i32 = arith.constant 0 : i32
    %c0_i32_0 = arith.constant 0 : i32
    %c0_i32_1 = arith.constant 0 : i32
    return %c0_i32, %c0_i32_0 : i32, i32
  }
  func.func @transform_4(%arg0: i32) -> (i32, i32) {
    %c0_i32 = arith.constant 0 : i32
    %c0_i32_0 = arith.constant 0 : i32
    return %arg0, %c0_i32 : i32, i32
  }
}

</mosaic_0001>

<bundles_post_ra>
// kernel: tpu_custom_call.1
= control target key start
LH: loop header
LB: loop body
LE: loop exit
PB: predicated region body
PF: predicated region fallthrough
CT: control target
= control target key end

     0   :  { %9 = vsyncpa [#allocation3], 0  ;;  %s799_s0 = inlined_call_operand.vmem [shape: f32[16,8], index: 0, kind: input, shape index: {}]   ;;  %s800_s1 = inlined_call_operand.vmem [shape: f32[16,4], index: 1, kind: input, shape index: {}]   ;;  %s801_s2 = inlined_call_operand.vmem [shape: f32[8,128], index: 2, kind: input, shape index: {}]   ;;  %s802_s3 = inlined_call_operand.vmem [shape: f32[4,128], index: 3, kind: input, shape index: {}]   ;;  %s803_s4 = inlined_call_operand.hbm [shape: f32[16,128], index: 4, kind: output, shape index: {}]  }
   0x1   :  { %11 = vsyncpa [#allocation3 + $0x1], 0  ;;  %s697_s15 = smov 0   ;;  %s699_s16 = smov 0  }
   0x2   :  { %s701_s17 = smov 0   ;;  %s703_s18 = smov 0  }
   0x3 LB: > { %s718_s19 = sadd.s32 4294967295, %s661_s18   ;;  %s520_s20 = sadd.s32 4294967294, %s661_s18   ;;  %s661_s18 = sphi %s703_s18, %s809_s18   ;;  %s657_s17 = sphi %s701_s17, %s808_s17   ;;  %s653_s16 = sphi %s699_s16, %s807_s16   ;;  %s649_s15 = sphi %s697_s15, %s806_s15  }
   0x4   : > { %s722_s21 = sadd.s32 1, %s661_s18   ;;  %s118_s22 = sadd.s32 1, %s657_s17 }
   0x5   : > { %s115_s23 = ssub.s32 %s661_s18, %s722_s21  ;;  %p128_p0 = scmp.ne.s32.totalorder %s657_s17, %s653_s16 }
   0x6   : > { %p116_p1 = scmp.eq.s32.totalorder %s115_s23, 0  ;;  %p129_p2 = scmp.eq.s32.totalorder %s718_s19, 1 }
   0x7   : > { %p134_p3 = scmp.ne.s32.totalorder %s653_s16, %s649_s15  ;;  %p135_p4 = scmp.eq.s32.totalorder %s520_s20, 1 }
   0x8   : > { %s733_s24 = scalar_select %p116_p1, %s657_s17, %s118_s22  }
   0x9   : > { %p735_p5 = por %p129_p2, %p128_p0  ;;  %p739_p6 = por %p135_p4, %p134_p3 }
   0xa   : > { %p523_p7 = scmp.ge.s32.totalorder %s661_s18, 1  ;;  %p173_p8 = scmp.lt.s32.totalorder %s661_s18, 3 }
   0xc   : > { %p174_p9 = pnand %p523_p7, %p173_p8 }
   0xd   : > { %p202_p10 = scmp.lt.s32.totalorder (!%p174_p9), %s718_s19, 1  ;;  %s664_s9 = smov (!%p174_p9), 126  }
   0xe   : > { %177 = sbr.rel (%p174_p9) target bundleno = 449 (0x1c1), region = 36  ;;  %s669_s12 = smov (!%p174_p9), 127  }
   0xf   : > { %s199_s20 = sand.u32 (!%p174_p9), 1, %s653_s16   ;;  %s529_s23 = sshll.u32 (!%p174_p9), %s718_s19, 7 }
  0x10   : > { %s524_s22 = sshll.u32 (!%p174_p9), %s199_s20, 3  ;;  %s436_s6 = scalar_lea.sflag (!%p174_p9), [#allocation3], %s199_s20 }
  0x13   : > { %s203_s27 = scalar_select %p202_p10, %s718_s19, 1  ;;  %vm211_vm0 = vcmask 64512   ;;  %v663_v4 = vmov 0   ;;  %v665_v5 = vmov 0.0   ;;  %v221_v6 = vld [vmem:[%s801_s2] sm:$0xff]  ;;  %v666_v7 = vmov 2  }
  0x14   : > { %586 = vset.pattern.permute.xlu1 %v663_v4  ;;  %534 = vmatprep.subr.mxu0 %v665_v5  ;;  %vm667_vm1 = vmmov 0   ;;  %v668_v8 = vmov 3   ;;  %v670_v17 = vmov 1   ;;  %v298_v24 = vld [vmem:[%s802_s3] sm:$0xf]  ;;  %v304_v27 = vlaneseq }
  0x15   : > { %s525_s28 = sshll.u32 %s203_s27, 3  ;;  %588 = vset.pattern.permute.xlu0 %v666_v7  ;;  %535 = vmatpush3.msra.mxu0 %v221_v6  ;;  %v350_v26 = vmul.f32 0.5, %v298_v24  ;;  %s201_s27 = scalar_lea.vmem [#allocation2], %s524_s22 }
  0x16   : > { %s205_s5 = scalar_lea.vmem %s799_s0, %s525_s28  ;;  %s209_s8 = scalar_lea.vmem %s800_s1, %s525_s28  ;;  %536 = vmatprep.mubr.msk.f32.mxu0 %vm667_vm1, %v665_v5  ;;  %v305_v30 = vshrl.u32 %v304_v27, 7 }
  0x17   : > { %v210_v0 = vld [vmem:[%s205_s5] sm:$0xff]  ;;  %v352_v28 = vrot.slane %v350_v26, 2  ;;  %s449_s28 = sshll.u32 %s201_s27, 4  ;;  %s447_s5 = scalar_lea.hbm %s803_s4, %s529_s23  ;;  %s450_s28 = int_to_ptr.vmem [resolvable:$true] %s449_s28 }
  0x18   : > { %v212_v1 = vsel %vm211_vm0, %v210_v0, -inf  ;;  %v297_v2 = vld [vmem:[%s209_s8] sm:$0xff]  ;;  %v316_v32 = vsub.s32 1, %v305_v30  ;;  %v306_v34 = vsub.s32 0, %v305_v30  ;;  %v338_v36 = vsub.s32 3, %v305_v30  ;;  %s601_s7 = scalar_lea.vmem %s450_s28, 128 }
  0x19   : > { %213 = vmax.xlane.f32.xlu0 %v212_v1  ;;  %v343_v3 = vmul.f32 0.5, %v297_v2  ;;  %v354_v31 = vsub.f32 %v298_v24, %v352_v28  ;;  %v355_v33 = vadd.f32 %v352_v28, %v298_v24  ;;  %v327_v41 = vsub.s32 2, %v305_v30  ;;  %p602_p11 = scmp.ne.s32.totalorder %s450_s28, %s601_s7  ;;  %s671_s8 = smov [#allocation2]  }
  0x1a   : > { %v339_v45 = vrot.slane %v298_v24, %v338_v36  ;;  %v317_v6 = vrot.slane %v298_v24, %v316_v32 }
  0x1b   : > { %v404_v35 = vrot.slane %v354_v31, %v316_v32  ;;  %v362_v39 = vsub.f32 %v355_v33, %v354_v31  ;;  %v385_v40 = vrot.slane %v354_v31, %v306_v34  ;;  %v395_v42 = vrot.slane %v355_v33, %v316_v32  ;;  %p603_p12 = pnand %p602_p11, %p735_p5 }
  0x1c   : > { %v375_v43 = vrot.slane %v355_v33, %v306_v34  ;;  %v328_v49 = vrot.slane %v298_v24, %v327_v41 }
  0x1d   : > { %v364_v47 = vrot.slane %v362_v39, 1  ;;  %p604_p13 = pneg %p603_p12 }
  0x1f   : > { %v366_v54 = vmul.f32 %v364_v47, %v362_v39 }
  0x21   : > { %v418_v59 = vrot.slane %v366_v54, %v306_v34 }
  0x2f   : > { %345 = vrot.lane.b32.xlu0 %v343_v3, %s664_s9  ;;  %s605_s9 = sshll.u32 %s671_s8, 4  ;;  %s606_s9 = int_to_ptr.vmem [resolvable:$false] %s605_s9 }
  0x30   : > { %s607_s19 = scalar_lea.vmem %s606_s9, 256  ;;  %p608_p0 = scmp.lt.s32.totalorder %s450_s28, %s606_s9 }
  0x31   : > { %p609_p1 = scmp.lt.s32.totalorder %s607_s19, %s601_s7 }
  0x33   : > { %322 = vperm.xlu0 %588, %v297_v2   ;;  %p610_p2 = por %p609_p1, %p608_p0 }
  0x35   : > { %p611_p3 = pnand %p610_p2, %p604_p13 }
  0x37   : > { %589 = vset.pattern.permute.xlu0 %v668_v8 }
  0x38   : > { %333 = vperm.xlu0 %589, %v297_v2  }
  0x3c   : > { %590 = vset.pattern.permute.xlu0 %v663_v4 }
  0xa2   : > { %v214_v9 = vpop.xlane.xlu0 %213 }
  0xa3   : > { %v215_v10 = vsub.f32 %v210_v0, %v214_v9 }
  0xa5   : > { %v216_v11 = vmul.f32 1.442695, %v215_v10 }
  0xa6   : > { %v346_v12 = vpop.permute.xlu0 %345 }
  0xa7   : > { %593 = vpow2.f32 %v216_v11  ;;  %v348_v13 = vsub.f32 %v297_v2, %v346_v12  ;;  %v349_v14 = vadd.f32 %v346_v12, %v297_v2 }
  0xa9   : > { %v356_v15 = vsub.f32 %v349_v14, %v348_v13 }
  0xab   : > { %358 = vrot.lane.b32.xlu1 %v356_v15, %s669_s12 }
  0xae   : > { %v323_v37 = vpop.permute.xlu0 %322 }
  0xaf   : > { %369 = vperm.xlu1 %586, %v349_v14   ;;  %v421_v56 = vadd.f32 %v328_v49, %v323_v37  ;;  %v329_v9 = vsub.f32 %v323_v37, %v328_v49 }
  0xb3   : > { %379 = vperm.xlu1 %586, %v348_v13   ;;  %v334_v46 = vpop.permute.xlu0 %333 }
  0xb4   : > { %v594_v16 = vpop.eup %593  ;;  %v423_v53 = vadd.f32 %v339_v45, %v334_v46  ;;  %v340_v11 = vsub.f32 %v334_v46, %v339_v45 }
  0xb5   : > { %537 = vmatmul.mubr.msk.f32.vlgmr.msra.gmra.mxu0 %vm211_vm0, %v594_v16  ;;  %v218_v18 = vsel %vm211_vm0, %v594_v16, 0.0 }
  0xb7   : > { %587 = vset.pattern.permute.xlu1 %v670_v17 }
  0xb8   : > { %389 = vperm.xlu1 %587, %v349_v14   ;;  %v330_v14 = vand.u32 2147483647, %v329_v9 }
  0xbc   : > { %398 = vperm.xlu1 %587, %v348_v13  }
  0xe0   : > { %219 = vadd.xlane.f32.xlu1 %v218_v18  ;;  %v341_v18 = vand.u32 2147483647, %v340_v11 }
 0x11d   : > { %v359_v19 = vpop.permute.xlu1 %358 }
 0x11e   : > { %v361_v20 = vmul.f32 %v359_v19, %v356_v15 }
 0x120   : > { %412 = vperm.xlu0 %590, %v361_v20  }
 0x124   : > { %301 = vperm.xlu0 %590, %v297_v2  }
 0x128   : > { %591 = vset.pattern.permute.xlu0 %v670_v17 }
 0x129   : > { %311 = vperm.xlu0 %591, %v297_v2  }
 0x12a   : > { %v370_v23 = vpop.permute.xlu1 %369 }
 0x12b   : > { %v376_v51 = vmin.f32 %v370_v23, %v375_v43 }
 0x12d   : > { %592 = vset.pattern.permute.xlu0 %v663_v4  ;;  %v307_v4 = vrot.slane %v298_v24, %v306_v34 }
 0x12e   : > { %v380_v25 = vpop.permute.xlu1 %379 }
 0x12f   : > { %v386_v48 = vmax.f32 %v380_v25, %v385_v40 }
 0x131   : > { %v387_v55 = vsub.f32 %v376_v51, %v386_v48 }
 0x133   : > { %v390_v29 = vpop.permute.xlu1 %389  ;;  %v422_v60 = vsub.f32 %v421_v56, %v387_v55  ;;  %v407_v61 = vmax.f32 %v387_v55, 0.0 }
 0x134   : > { %v396_v50 = vmin.f32 %v390_v29, %v395_v42 }
 0x137   : > { %v399_v38 = vpop.permute.xlu1 %398 }
 0x138   : > { %v405_v44 = vmax.f32 %v399_v38, %v404_v35 }
 0x13a   : > { %v406_v52 = vsub.f32 %v396_v50, %v405_v44 }
 0x13c   : > { %v424_v57 = vsub.f32 %v423_v53, %v406_v52  ;;  %v408_v58 = vmax.f32 %v406_v52, 0.0 }
 0x13e   : > { %v425_v63 = vmul.f32 %v424_v57, %v422_v60  ;;  %v409_v1 = vmul.f32 %v408_v58, %v407_v61 }
 0x169   : > { %v220_v62 = vpop.xlane.xlu1 %219 }
 0x16a   : > { %595 = vrcp.f32 %v220_v62 }
 0x16b   : > { %597 = vrcp.f32 %v425_v63 }
 0x175   : > { %v759_v21 = vpop.f32.mrf.mxu0 }
 0x177   : > { %v538_v22 = vpop.f32.mrf.mxu0  ;;  %v596_v16 = vpop.eup %595 }
 0x178   : > { %v598_v20 = vpop.eup %597  ;;  %v296_v23 = vmul.f32 %v596_v16, %v759_v21 }
 0x19b   : > { %v413_v0 = vpop.permute.xlu0 %412 }
 0x19c   : > { %v419_v2 = vadd.f32 %v418_v59, %v413_v0 }
 0x19e   : > { %v420_v3 = vsub.f32 %v419_v2, %v409_v1 }
 0x19f   : > { %v302_v5 = vpop.permute.xlu0 %301 }
 0x1a0   : > { %599 = vrcp.f32 %v420_v3  ;;  %v308_v7 = vsub.f32 %v302_v5, %v307_v4  ;;  %v428_v17 = vsub.f32 %v425_v63, %v420_v3 }
 0x1a2   : > { %v309_v12 = vand.u32 2147483647, %v308_v7  ;;  %v430_v26 = vmul.f32 %v598_v20, %v428_v17 }
 0x1a4   : > { %v312_v8 = vpop.permute.xlu0 %311 }
 0x1a5   : > { %v318_v10 = vsub.f32 %v312_v8, %v317_v6 }
 0x1a7   : > { %v319_v13 = vand.u32 2147483647, %v318_v10 }
 0x1a9   : > { %v320_v15 = vadd.f32 %v319_v13, %v309_v12 }
 0x1ab   : > { %v331_v19 = vadd.f32 %v330_v14, %v320_v15 }
 0x1ad   : > { %v600_v22 = vpop.eup %599  ;;  %v342_v24 = vadd.f32 %v341_v18, %v331_v19 }
 0x1ae   : > { %v427_v25 = vmul.f32 %v600_v22, %v409_v1 }
 0x1af   : > { %v432_v27 = vadd.f32 %v342_v24, %v296_v23 }
 0x1b0   : > { %v431_v28 = vsub.f32 %v430_v26, %v427_v25 }
 0x1b2   : > { %v433_v29 = vadd.f32 %v432_v27, %v431_v28 }
 0x1b4   : > { %434 = vst [vmem:[%s201_s27] sm:$0xff] %v433_v29 }
 0x1b5   : > { %614 = shalt.err (!%p611_p3)
}
 0x1b6   : > { %s615_s10 = scalar_lea.hbm %s447_s5, 128  ;;  %s619_s13 = scalar_lea.hbm %s803_s4, 256 }
 0x1b7   : > { %p616_p4 = scmp.ne.s32.totalorder %s447_s5, %s615_s10  ;;  %p620_p9 = scmp.lt.s32.totalorder %s447_s5, %s803_s4 }
 0x1b8   : > { %p621_p10 = scmp.lt.s32.totalorder %s619_s13, %s615_s10 }
 0x1b9   : > { %p617_p7 = pnand %p616_p4, %p735_p5 }
 0x1ba   : > { %p622_p11 = por %p621_p10, %p620_p9 }
 0x1bb   : > { %p618_p8 = pneg %p617_p7 }
 0x1bd   : > { %p623_p12 = pnand %p622_p11, %p618_p8 }
 0x1bf   : > { %626 = shalt.err (!%p623_p12)
}
 0x1c0   : > { %539 = dma.vmem_to_hbm [thread:$0]  (%p735_p5), %s450_s28, 128, %s447_s5, %s436_s6  }
 0x1c1 PF: > { %p545_p13 = scmp.ge.s32.totalorder %s661_s18, 2  ;;  %s461_s22 = sand.u32 1, %s649_s15  }
 0x1c2   : > { %s462_s23 = scalar_lea.sflag [#allocation3], %s461_s22 }
 0x1c3   : > { %p542_p0 = pnand %p545_p13, %p739_p6 }
 0x1c5   : > { %p543_p1 = pneg %p542_p0 }
 0x1c7   : > { %644 = dma.done.wait (%p543_p1), %s462_s23, 128  }
 0x1c8   : > { %646 = vsyncadd (%p543_p1), %s462_s23, 4294967168  ;;  %p14_p2 = scmp.ge.s32.totalorder %s722_s21, 4   ;;  %s806_s15 = smov %s653_s16 }
 0x1c9   : > { %s807_s16 = smov %s657_s17  ;;  %s808_s17 = smov %s733_s24 }
 0x1ca   : > { %s809_s18 = smov %s722_s21  ;;  %16 = sbr.rel (!%p14_p2) target bundleno = 3 (0x3), region = 74 }
 0x1cf   :  { %467 = vsyncpa [#allocation3], 1 }
 0x1d0   :  { %469 = vsyncpa [#allocation3 + $0x1], 1 }

</bundles_post_ra>
